<compile_context>
chip_gen: v6e
topology: v6e:2x2x1
jax: 0.10.0
libtpu: 0.0.40
codegen_flags: <defaults>
</compile_context>

<pallas_src>
import functools

import jax
import jax.numpy as jnp
from jax import lax
from jax.experimental import pallas as pl
from jax.experimental.pallas import tpu as pltpu


def _round_up(x, m):
    return (x + m - 1) // m * m


def _padded_bytes(rows, cols, itemsize):
    """VMEM footprint of a 2-D buffer after (sublane, lane) tiling/padding."""
    sublane = 8 * max(1, 4 // itemsize)          # f32 tiles (8,128); bf16 (16,128)
    return _round_up(max(rows, 1), sublane) * _round_up(max(cols, 1), 128) * itemsize


def _tpu_hw():
    """-> (per-core VMEM bytes, TensorCores per chip, VPU has bf16)."""
    kind = ""
    try:
        kind = jax.devices()[0].device_kind.lower()
    except Exception:
        pass
    cap = None
    try:
        cap = int(pltpu.get_tpu_info().vmem_capacity_bytes)
    except Exception:
        cap = None
    if "v7" in kind:
        # 64 MiB per TensorCore on v7x regardless of what the chip-level query says.
        return (min(cap, 64 << 20) if cap else (64 << 20)), 2, True
    if "v6" in kind:
        return (cap or (128 << 20)), 1, True
    if "v5" in kind:
        return (cap or (128 << 20)), 1, False
    # Unknown / older generation: conservative defaults.
    return (cap or (64 << 20)), 1, False


def _vmem_need(F_in, mid, F_out, block_b, x_itemsize, out_itemsize, cd_itemsize):
    """Honest VMEM estimate: Buffered(1) residents once, I/O tiles double-buffered."""
    w = (_padded_bytes(mid, F_in, cd_itemsize)
         + _padded_bytes(mid, mid, cd_itemsize)
         + _padded_bytes(F_out, mid, cd_itemsize))
    b = 2 * _padded_bytes(mid, 1, 4) + _padded_bytes(F_out, 1, 4)
    io = 2 * (_padded_bytes(block_b, F_in, x_itemsize)          # natural-layout x tile
              + _padded_bytes(F_out, block_b, out_itemsize))    # transposed out tile
    h = 2 * _padded_bytes(mid, block_b, 4)                      # f32 h1/h2 intermediates
    return w + b + io + h


def _pick_block_b(B, F_in, mid, F_out, x_itemsize, out_itemsize, cd_itemsize,
                  *, num_cores, vmem_budget, max_block=2048):
    """Batch tile width (lane axis of all intermediates / output tile)."""
    def need(bb):
        return _vmem_need(F_in, mid, F_out, bb, x_itemsize, out_itemsize, cd_itemsize)

    # Largest multiple of 128 (<= max_block) whose VMEM estimate fits the budget.
    while max_block > 128 and need(max_block) > vmem_budget:
        max_block -= 128

    if num_cores <= 1:
        # Single TensorCore (v5e/v6e): fewest, biggest steps — splitting only adds
        # ~0.35us/step pipeline overhead and shrinks the lane tile.
        return min(_round_up(B, 128), max_block)

    # v7x megacore: the ("parallel",) grid axis is sharded across 2 TCs, so use >= 2
    # and an even number of steps so neither core idles on a tail step.
    steps = max(2, pl.cdiv(B, max_block))
    if steps % 2:
        steps += 1
    return min(_round_up(pl.cdiv(B, steps), 128), max_block)


def _relu_cast(h, compute_dtype, low_precision_relu):
    # relu and a downcast commute at 0; on bf16-VPU chips (v6e/v7x) cast first so the
    # max runs on packed bf16 vregs (2x elements per VALU op).  f32 order for v5e.
    if low_precision_relu:
        return jnp.maximum(h.astype(compute_dtype), 0.0)
    return jnp.maximum(h, 0.0).astype(compute_dtype)


def _mlp_kernel(x_ref, w1_ref, b1_ref, w2_ref, b2_ref, w3_ref, b3_ref, oT_ref,
                *, compute_dtype, low_precision_relu):
    # x arrives in its natural (block_b, F_in) layout; contracting the shared F_in
    # axis directly ('of,bf->ob') puts batch on the lane axis of every intermediate
    # without any transpose of x.
    x = x_ref[...].astype(compute_dtype)
    h1 = lax.dot_general(w1_ref[...], x, (((1,), (1,)), ((), ())),
                         preferred_element_type=jnp.float32) + b1_ref[...]
    h1 = _relu_cast(h1, compute_dtype, low_precision_relu)            # (mid, block_b)
    h2 = jnp.dot(w2_ref[...], h1, preferred_element_type=jnp.float32) + b2_ref[...]
    h2 = _relu_cast(h2, compute_dtype, low_precision_relu)            # (mid, block_b)
    h3 = jnp.dot(w3_ref[...], h2, preferred_element_type=jnp.float32) + b3_ref[...]
    # Final ReLU (as in the PyTorch module) + lane-dense store: last dim = block_b
    # (multiple of 128) -> full `vst`, no masked partial stores.
    oT_ref[...] = jnp.maximum(h3, 0.0).astype(oT_ref.dtype)


def translation_net_forward(x, params, *, block_b=None, out_dtype=None,
                            compute_dtype=jnp.bfloat16):
    """Forward pass of TranslationNet: relu(L3(relu(L2(relu(L1(x)))))).

    x: (B, N//2).  params: w1/w2/w3 in PyTorch (out_features, in_features) layout,
    b1/b2/b3 with shape (out_features,).  Returns (B, N//2).
    """
    B, F_in = x.shape
    mid, f_in_w = params["w1"].shape
    F_out = params["w3"].shape[0]
    assert f_in_w == F_in
    out_dtype = x.dtype if out_dtype is None else out_dtype

    vmem_cap, num_cores, vpu_bf16 = _tpu_hw()
    vmem_budget = int(vmem_cap * 0.85)
    cd_itemsize = jnp.dtype(compute_dtype).itemsize
    out_itemsize = jnp.dtype(out_dtype).itemsize
    x_itemsize = jnp.dtype(x.dtype).itemsize

    if block_b is None:
        block_b = _pick_block_b(B, F_in, mid, F_out, x_itemsize, out_itemsize,
                                cd_itemsize, num_cores=num_cores,
                                vmem_budget=vmem_budget)

    B_pad = _round_up(B, block_b)
    x_in = x if B_pad == B else jnp.pad(x, ((0, B_pad - B), (0, 0)))

    # Weights cast once in the wrapper (small, grid-invariant); biases stay f32 and
    # are reshaped to (out, 1) so they broadcast over the lane (batch) axis.
    w1 = params["w1"].astype(compute_dtype)
    w2 = params["w2"].astype(compute_dtype)
    w3 = params["w3"].astype(compute_dtype)
    b1 = params["b1"].reshape(mid, 1).astype(jnp.float32)
    b2 = params["b2"].reshape(mid, 1).astype(jnp.float32)
    b3 = params["b3"].reshape(F_out, 1).astype(jnp.float32)

    # Honest VMEM request (no 2x hedge, single-buffered residents counted once),
    # ~25% headroom for compiler scratch, capped at ~85% of per-core VMEM.
    need = _vmem_need(F_in, mid, F_out, block_b, x_itemsize, out_itemsize, cd_itemsize)
    vmem_limit = int(min(max(int(need * 1.25) + (4 << 20), 32 << 20), vmem_budget))

    def _resident(arr):
        # Grid-invariant operand: whole-array block, constant index map, single
        # buffer (Buffered(1)) -> fetched once, half the default VMEM footprint.
        return pl.BlockSpec(arr.shape, lambda i: (0, 0), pipeline_mode=pl.Buffered(1))

    # NOTE: for very large middle_dim (mid^2 * itemsize approaching the VMEM budget,
    # ~4-5K on v7x) whole-W2/W3 residency stops fitting; that regime would need a
    # K-tiled second ("arbitrary") grid axis with an f32 scratch accumulator.  Not
    # needed for this module's configurations.
    kernel = functools.partial(_mlp_kernel, compute_dtype=compute_dtype,
                               low_precision_relu=(vpu_bf16 and cd_itemsize < 4))

    out_t = pl.pallas_call(
        kernel,
        out_shape=jax.ShapeDtypeStruct((F_out, B_pad), out_dtype),
        grid_spec=pl.GridSpec(
            grid=(B_pad // block_b,),
            in_specs=[
                pl.BlockSpec((block_b, F_in), lambda i: (i, 0)),   # natural-layout x tile
                _resident(w1), _resident(b1),
                _resident(w2), _resident(b2),
                _resident(w3), _resident(b3),
            ],
            out_specs=pl.BlockSpec((F_out, block_b), lambda i: (0, i)),
        ),
        compiler_params=pltpu.CompilerParams(
            dimension_semantics=("parallel",),
            vmem_limit_bytes=vmem_limit,
        ),
    )(x_in, w1, b1, w2, b2, w3, b3)

    # F_out is tiny for this module, so the lane-dense transposed output plus this
    # cheap slice/transpose beats masked (block_b, F_out) stores inside the kernel.
    return out_t[:, :B].T


def init_params(key, N, middle_dim, dtype=jnp.float32):
    """nn.Linear-style init; weights (out_features, in_features), biases (out_features,)."""
    half = N // 2
    dims = [(half, middle_dim), (middle_dim, middle_dim), (middle_dim, half)]
    params = {}
    keys = jax.random.split(key, 6)
    for idx, (fan_in, fan_out) in enumerate(dims, start=1):
        bound = 1.0 / (fan_in ** 0.5)
        params[f"w{idx}"] = jax.random.uniform(
            keys[2 * (idx - 1)], (fan_out, fan_in), minval=-bound, maxval=bound, dtype=dtype)
        params[f"b{idx}"] = jax.random.uniform(
            keys[2 * (idx - 1) + 1], (fan_out,), minval=-bound, maxval=bound, dtype=dtype)
    return params


def reference_forward(x, params, *, matmul_dtype=jnp.float32):
    """Pure-JAX reference of the PyTorch module (ReLU after every Linear)."""
    def layer(h, w, b):
        y = jnp.dot(h.astype(matmul_dtype), w.T.astype(matmul_dtype),
                    preferred_element_type=jnp.float32) + b.reshape(1, -1).astype(jnp.float32)
        return jax.nn.relu(y)
    h = layer(x, params["w1"], params["b1"])
    h = layer(h, params["w2"], params["b2"])
    return layer(h, params["w3"], params["b3"])


if __name__ == "__main__":
    N = 16            # PyTorch module's `shape` -> feature dim N // 2 = 8
    middle_dim = 32
    batch = 512       # one 512-wide tile on v5e/v6e, two 256-wide tiles on v7x

    key = jax.random.PRNGKey(0)
    k_x, k_p = jax.random.split(key)
    x = jax.random.normal(k_x, (batch, N // 2), dtype=jnp.float32)
    params = init_params(k_p, N, middle_dim)

    out = translation_net_forward(x, params)
    out = jax.block_until_ready(out)
    assert out.shape == (batch, N // 2)

    # Tight check vs a reference that applies the same bf16 rounding to x / W.
    ref_bf16 = reference_forward(x, params, matmul_dtype=jnp.bfloat16)
    assert jnp.allclose(out, ref_bf16, rtol=1e-3, atol=1e-3), "mismatch vs bf16-matched reference"
    # Loose check vs the exact f32 (PyTorch-semantics) reference.
    ref_f32 = reference_forward(x, params, matmul_dtype=jnp.float32)
    assert jnp.allclose(out, ref_f32, rtol=5e-2, atol=5e-2), "mismatch vs f32 reference"

    print("KERNEL_OK")
</pallas_src>

<mosaic_0001>
module attributes {stable_mosaic.version = 11 : i64} {
  func.func @_mlp_kernel(%arg0: i32, %arg1: memref<512x8xf32, #tpu.memory_space<vmem>>, %arg2: memref<32x8xbf16, #tpu.memory_space<vmem>>, %arg3: memref<32x1xf32, #tpu.memory_space<vmem>>, %arg4: memref<32x32xbf16, #tpu.memory_space<vmem>>, %arg5: memref<32x1xf32, #tpu.memory_space<vmem>>, %arg6: memref<8x32xbf16, #tpu.memory_space<vmem>>, %arg7: memref<8x1xf32, #tpu.memory_space<vmem>>, %arg8: memref<8x512xf32, #tpu.memory_space<vmem>>) attributes {dimension_semantics = [#tpu.dimension_semantics<parallel>], iteration_bounds = array<i64: 1>, scalar_prefetch = 0 : i64, scratch_operands = 0 : i64, tpu.core_type = #tpu.core_type<tc>, window_params = [{transform_indices = @transform_0, window_bounds = array<i64: 512, 8>}, {pipeline_mode = #tpu.pipeline_mode<synchronous>, transform_indices = @transform_1, window_bounds = array<i64: 32, 8>}, {pipeline_mode = #tpu.pipeline_mode<synchronous>, transform_indices = @transform_2, window_bounds = array<i64: 32, 1>}, {pipeline_mode = #tpu.pipeline_mode<synchronous>, transform_indices = @transform_3, window_bounds = array<i64: 32, 32>}, {pipeline_mode = #tpu.pipeline_mode<synchronous>, transform_indices = @transform_4, window_bounds = array<i64: 32, 1>}, {pipeline_mode = #tpu.pipeline_mode<synchronous>, transform_indices = @transform_5, window_bounds = array<i64: 8, 32>}, {pipeline_mode = #tpu.pipeline_mode<synchronous>, transform_indices = @transform_6, window_bounds = array<i64: 8, 1>}, {transform_indices = @transform_7, window_bounds = array<i64: 8, 512>}]} {
    %c0 = arith.constant 0 : index
    %c0_0 = arith.constant 0 : index
    %0 = vector.load %arg1[%c0, %c0_0] : memref<512x8xf32, #tpu.memory_space<vmem>>, vector<512x8xf32>
    %1 = arith.truncf %0 : vector<512x8xf32> to vector<512x8xbf16>
    %c0_1 = arith.constant 0 : index
    %c0_2 = arith.constant 0 : index
    %2 = vector.load %arg2[%c0_1, %c0_2] : memref<32x8xbf16, #tpu.memory_space<vmem>>, vector<32x8xbf16>
    %cst = arith.constant dense<0.000000e+00> : vector<32x512xf32>
    %3 = tpu.matmul %2, %1, %cst {dimension_numbers = #tpu.dot_dimension_numbers<[1], [1], [0], [0], [0, 0, 1, 0], [], []>} : vector<32x8xbf16>, vector<512x8xbf16>, vector<32x512xf32> -> vector<32x512xf32>
    %c0_3 = arith.constant 0 : index
    %c0_4 = arith.constant 0 : index
    %4 = vector.load %arg3[%c0_3, %c0_4] : memref<32x1xf32, #tpu.memory_space<vmem>>, vector<32x1xf32>
    %5 = vector.broadcast %4 : vector<32x1xf32> to vector<32x512xf32>
    %6 = arith.addf %3, %5 : vector<32x512xf32>
    %cst_5 = arith.constant 0.000000e+00 : f32
    %7 = vector.broadcast %cst_5 : f32 to vector<32x512xf32>
    %8 = arith.maximumf %6, %7 : vector<32x512xf32>
    %9 = arith.truncf %8 : vector<32x512xf32> to vector<32x512xbf16>
    %c0_6 = arith.constant 0 : index
    %c0_7 = arith.constant 0 : index
    %10 = vector.load %arg4[%c0_6, %c0_7] : memref<32x32xbf16, #tpu.memory_space<vmem>>, vector<32x32xbf16>
    %cst_8 = arith.constant dense<0.000000e+00> : vector<32x512xf32>
    %11 = tpu.matmul %10, %9, %cst_8 {dimension_numbers = #tpu.dot_dimension_numbers<[1], [0], [0], [1], [0, 0, 1, 1], [], []>} : vector<32x32xbf16>, vector<32x512xbf16>, vector<32x512xf32> -> vector<32x512xf32>
    %c0_9 = arith.constant 0 : index
    %c0_10 = arith.constant 0 : index
    %12 = vector.load %arg5[%c0_9, %c0_10] : memref<32x1xf32, #tpu.memory_space<vmem>>, vector<32x1xf32>
    %13 = vector.broadcast %12 : vector<32x1xf32> to vector<32x512xf32>
    %14 = arith.addf %11, %13 : vector<32x512xf32>
    %cst_11 = arith.constant 0.000000e+00 : f32
    %15 = vector.broadcast %cst_11 : f32 to vector<32x512xf32>
    %16 = arith.maximumf %14, %15 : vector<32x512xf32>
    %17 = arith.truncf %16 : vector<32x512xf32> to vector<32x512xbf16>
    %c0_12 = arith.constant 0 : index
    %c0_13 = arith.constant 0 : index
    %18 = vector.load %arg6[%c0_12, %c0_13] : memref<8x32xbf16, #tpu.memory_space<vmem>>, vector<8x32xbf16>
    %cst_14 = arith.constant dense<0.000000e+00> : vector<8x512xf32>
    %19 = tpu.matmul %18, %17, %cst_14 {dimension_numbers = #tpu.dot_dimension_numbers<[1], [0], [0], [1], [0, 0, 1, 1], [], []>} : vector<8x32xbf16>, vector<32x512xbf16>, vector<8x512xf32> -> vector<8x512xf32>
    %c0_15 = arith.constant 0 : index
    %c0_16 = arith.constant 0 : index
    %20 = vector.load %arg7[%c0_15, %c0_16] : memref<8x1xf32, #tpu.memory_space<vmem>>, vector<8x1xf32>
    %21 = vector.broadcast %20 : vector<8x1xf32> to vector<8x512xf32>
    %22 = arith.addf %19, %21 : vector<8x512xf32>
    %cst_17 = arith.constant 0.000000e+00 : f32
    %23 = vector.broadcast %cst_17 : f32 to vector<8x512xf32>
    %24 = arith.maximumf %22, %23 : vector<8x512xf32>
    %c0_18 = arith.constant 0 : index
    %c0_19 = arith.constant 0 : index
    %25 = vector.load %arg8[%c0_18, %c0_19] : memref<8x512xf32, #tpu.memory_space<vmem>>, vector<8x512xf32>
    tpu.vector_store %arg8[%c0_18, %c0_19], %24 {strides = array<i32>} : memref<8x512xf32, #tpu.memory_space<vmem>>, vector<8x512xf32>,
    return
  }
  func.func @transform_0(%arg0: i32) -> (i32, i32) {
    %c0_i32 = arith.constant 0 : i32
    %c0_i32_0 = arith.constant 0 : i32
    return %arg0, %c0_i32 : i32, i32
  }
  func.func @transform_1(%arg0: i32) -> (i32, i32) {
    %c0_i32 = arith.constant 0 : i32
    %c0_i32_0 = arith.constant 0 : i32
    %c0_i32_1 = arith.constant 0 : i32
    return %c0_i32, %c0_i32_0 : i32, i32
  }
  func.func @transform_2(%arg0: i32) -> (i32, i32) {
    %c0_i32 = arith.constant 0 : i32
    %c0_i32_0 = arith.constant 0 : i32
    %c0_i32_1 = arith.constant 0 : i32
    return %c0_i32, %c0_i32_0 : i32, i32
  }
  func.func @transform_3(%arg0: i32) -> (i32, i32) {
    %c0_i32 = arith.constant 0 : i32
    %c0_i32_0 = arith.constant 0 : i32
    %c0_i32_1 = arith.constant 0 : i32
    return %c0_i32, %c0_i32_0 : i32, i32
  }
  func.func @transform_4(%arg0: i32) -> (i32, i32) {
    %c0_i32 = arith.constant 0 : i32
    %c0_i32_0 = arith.constant 0 : i32
    %c0_i32_1 = arith.constant 0 : i32
    return %c0_i32, %c0_i32_0 : i32, i32
  }
  func.func @transform_5(%arg0: i32) -> (i32, i32) {
    %c0_i32 = arith.constant 0 : i32
    %c0_i32_0 = arith.constant 0 : i32
    %c0_i32_1 = arith.constant 0 : i32
    return %c0_i32, %c0_i32_0 : i32, i32
  }
  func.func @transform_6(%arg0: i32) -> (i32, i32) {
    %c0_i32 = arith.constant 0 : i32
    %c0_i32_0 = arith.constant 0 : i32
    %c0_i32_1 = arith.constant 0 : i32
    return %c0_i32, %c0_i32_0 : i32, i32
  }
  func.func @transform_7(%arg0: i32) -> (i32, i32) {
    %c0_i32 = arith.constant 0 : i32
    %c0_i32_0 = arith.constant 0 : i32
    return %c0_i32, %arg0 : i32, i32
  }
}

</mosaic_0001>

<bundles_post_ra>
// kernel: tpu_custom_call.1
= control target key start
LH: loop header
LB: loop body
LE: loop exit
PB: predicated region body
PF: predicated region fallthrough
CT: control target
= control target key end

     0   :  { %vm162_vm0 = vcmask 64512   ;;  %v784_v7 = vmov 0   ;;  %s1123_s0 = inlined_call_operand.vmem [shape: f32[512,8], index: 0, kind: input, shape index: {}]   ;;  %s1124_s1 = inlined_call_operand.vmem [shape: bf16[32,8], index: 1, kind: input, shape index: {}]   ;;  %s1125_s2 = inlined_call_operand.vmem [shape: f32[32,1], index: 2, kind: input, shape index: {}]   ;;  %s1126_s3 = inlined_call_operand.vmem [shape: bf16[32,32], index: 3, kind: input, shape index: {}]   ;;  %s1127_s4 = inlined_call_operand.vmem [shape: f32[32,1], index: 4, kind: input, shape index: {}]   ;;  %s1128_s5 = inlined_call_operand.vmem [shape: bf16[8,32], index: 5, kind: input, shape index: {}]   ;;  %s1129_s6 = inlined_call_operand.vmem [shape: f32[8,1], index: 6, kind: input, shape index: {}]   ;;  %s1130_s7 = inlined_call_operand.hbm [shape: f32[8,512], index: 7, kind: output, shape index: {}]  }
   0x1   :  { %v58_v0 = vld [vmem:[%s1123_s0 + $0xf0] sm:$0xff]  ;;  %v59_v1 = vld [vmem:[%s1123_s0 + $0xf8] sm:$0xff]  ;;  %756 = vset.pattern.permute.xlu0 %v784_v7  ;;  %757 = vset.pattern.permute.xlu1 %v784_v7  ;;  %v56_v12 = vld [vmem:[%s1123_s0 + $0xe0] sm:$0xff] }
   0x2   :  { %v90_v2 = vld [vmem:[%s1123_s0 + $0x1f0] sm:$0xff]  ;;  %v107_v3 = vpack.c.bf16 %v59_v1, %v58_v0  ;;  %v91_v4 = vld [vmem:[%s1123_s0 + $0x1f8] sm:$0xff]  ;;  %v57_v14 = vld [vmem:[%s1123_s0 + $0xe8] sm:$0xff] }
   0x3   :  { %v42_v5 = vld [vmem:[%s1123_s0 + $0x70] sm:$0xff]  ;;  %v43_v6 = vld [vmem:[%s1123_s0 + $0x78] sm:$0xff]  ;;  %v123_v8 = vpack.c.bf16 %v91_v4, %v90_v2  ;;  %v88_v15 = vld [vmem:[%s1123_s0 + $0x1e0] sm:$0xff]  ;;  %v106_v18 = vpack.c.bf16 %v57_v14, %v56_v12 }
   0x4   :  { %v99_v9 = vpack.c.bf16 %v43_v6, %v42_v5  ;;  %v74_v10 = vld [vmem:[%s1123_s0 + $0x170] sm:$0xff]  ;;  %v75_v11 = vld [vmem:[%s1123_s0 + $0x178] sm:$0xff]  ;;  %738 = vmatprep.subr.msk.bf16.mxu0 %vm162_vm0, %v107_v3  ;;  %v89_v16 = vld [vmem:[%s1123_s0 + $0x1e8] sm:$0xff] }
   0x5   :  { %v115_v13 = vpack.c.bf16 %v75_v11, %v74_v10  ;;  %746 = vmatprep.subr.msk.bf16.mxu1 %vm162_vm0, %v123_v8  ;;  %v122_v19 = vpack.c.bf16 %v89_v16, %v88_v15  ;;  %v40_v20 = vld [vmem:[%s1123_s0 + $0x60] sm:$0xff]  ;;  %v41_v21 = vld [vmem:[%s1123_s0 + $0x68] sm:$0xff]  ;;  %v54_v27 = vld [vmem:[%s1123_s0 + $0xd0] sm:$0xff] }
   0x6   :  { %v191_v17 = vsel %vm162_vm0, %v99_v9, 0  ;;  %v72_v22 = vld [vmem:[%s1123_s0 + $0x160] sm:$0xff]  ;;  %v73_v24 = vld [vmem:[%s1123_s0 + $0x168] sm:$0xff]  ;;  %v98_v25 = vpack.c.bf16 %v41_v21, %v40_v20  ;;  %v55_v28 = vld [vmem:[%s1123_s0 + $0xd8] sm:$0xff] }
   0x7   :  { %699 = vmatpush3.bf16.xpose.msra.mxu0 %v191_v17  ;;  %v239_v23 = vsel %vm162_vm0, %v115_v13, 0  ;;  %v114_v26 = vpack.c.bf16 %v73_v24, %v72_v22  ;;  %v86_v29 = vld [vmem:[%s1123_s0 + $0x1d0] sm:$0xff]  ;;  %v87_v30 = vld [vmem:[%s1123_s0 + $0x1d8] sm:$0xff]  ;;  %v105_v32 = vpack.c.bf16 %v55_v28, %v54_v27  ;;  %v52_v41 = vld [vmem:[%s1123_s0 + $0xc0] sm:$0xff] }
   0x8   :  { %719 = vmatpush3.bf16.xpose.msra.mxu1 %v239_v23  ;;  %739 = vmatprep.subr.msk.bf16.mxu0 %vm162_vm0, %v106_v18  ;;  %v188_v31 = vsel %vm162_vm0, %v98_v25, 0  ;;  %v121_v34 = vpack.c.bf16 %v87_v30, %v86_v29  ;;  %v38_v35 = vld [vmem:[%s1123_s0 + $0x50] sm:$0xff]  ;;  %v39_v36 = vld [vmem:[%s1123_s0 + $0x58] sm:$0xff]  ;;  %v53_v42 = vld [vmem:[%s1123_s0 + $0xc8] sm:$0xff] }
   0x9   :  { %747 = vmatprep.subr.msk.bf16.mxu1 %vm162_vm0, %v122_v19  ;;  %v236_v33 = vsel %vm162_vm0, %v114_v26, 0  ;;  %v70_v37 = vld [vmem:[%s1123_s0 + $0x150] sm:$0xff]  ;;  %v71_v38 = vld [vmem:[%s1123_s0 + $0x158] sm:$0xff]  ;;  %v97_v39 = vpack.c.bf16 %v39_v36, %v38_v35  ;;  %v84_v43 = vld [vmem:[%s1123_s0 + $0x1c0] sm:$0xff]  ;;  %v104_v46 = vpack.c.bf16 %v53_v42, %v52_v41 }
   0xa   :  { %v113_v40 = vpack.c.bf16 %v71_v38, %v70_v37  ;;  %v85_v44 = vld [vmem:[%s1123_s0 + $0x1c8] sm:$0xff]  ;;  %v36_v47 = vld [vmem:[%s1123_s0 + $0x40] sm:$0xff]  ;;  %v50_v56 = vld [vmem:[%s1123_s0 + $0xb0] sm:$0xff] }
   0xb   :  { %v185_v45 = vsel %vm162_vm0, %v97_v39, 0  ;;  %v37_v48 = vld [vmem:[%s1123_s0 + $0x48] sm:$0xff]  ;;  %v120_v50 = vpack.c.bf16 %v85_v44, %v84_v43  ;;  %v68_v51 = vld [vmem:[%s1123_s0 + $0x140] sm:$0xff]  ;;  %v51_v57 = vld [vmem:[%s1123_s0 + $0xb8] sm:$0xff] }
   0xc   :  { %v233_v49 = vsel %vm162_vm0, %v113_v40, 0  ;;  %v69_v52 = vld [vmem:[%s1123_s0 + $0x148] sm:$0xff]  ;;  %v96_v53 = vpack.c.bf16 %v37_v48, %v36_v47  ;;  %v940_v55 = vld [vmem:[%s1124_s1] sm:$0xff]   ;;  %v130_v58 = vld [vmem:[%s1125_s2 + $0x10] sm:$0xff]  ;;  %v103_v2 = vpack.c.bf16 %v51_v57, %v50_v56 }
   0xd   :  { %v112_v54 = vpack.c.bf16 %v69_v52, %v68_v51  ;;  %v82_v59 = vld [vmem:[%s1123_s0 + $0x1b0] sm:$0xff]  ;;  %v83_v60 = vld [vmem:[%s1123_s0 + $0x1b8] sm:$0xff]  ;;  %714 = vmatprep.mubr.msk.bf16.mxu0 %vm162_vm0, %v940_v55  ;;  %734 = vmatprep.mubr.msk.bf16.mxu1 %vm162_vm0, %v940_v55  ;;  %v128_v61 = vld [vmem:[%s1125_s2] sm:$0xff] }
   0xe   :  { %v182_v62 = vsel %vm162_vm0, %v96_v53, 0  ;;  %v34_v63 = vld [vmem:[%s1123_s0 + $0x30] sm:$0xff]  ;;  %v35_v0 = vld [vmem:[%s1123_s0 + $0x38] sm:$0xff]  ;;  %144 = vperm.xlu0 %756, %v130_v58   ;;  %134 = vperm.xlu1 %757, %v128_v61   ;;  %v119_v4 = vpack.c.bf16 %v83_v60, %v82_v59 }
   0xf   :  { %701 = vmatpush3.bf16.xpose.msra.mxu0 %v188_v31  ;;  %v230_v1 = vsel %vm162_vm0, %v112_v54, 0  ;;  %v131_v3 = vld [vmem:[%s1125_s2 + $0x18] sm:$0xff] }
  0x10   :  { %721 = vmatpush3.bf16.xpose.msra.mxu1 %v236_v33  ;;  %740 = vmatprep.subr.msk.bf16.mxu0 %vm162_vm0, %v105_v32 }
  0x11   :  { %748 = vmatprep.subr.msk.bf16.mxu1 %vm162_vm0, %v121_v34 }
  0x17   :  { %703 = vmatpush3.bf16.xpose.msra.mxu0 %v185_v45 }
  0x18   :  { %723 = vmatpush3.bf16.xpose.msra.mxu1 %v233_v49  ;;  %741 = vmatprep.subr.msk.bf16.mxu0 %vm162_vm0, %v104_v46 }
  0x19   :  { %749 = vmatprep.subr.msk.bf16.mxu1 %vm162_vm0, %v120_v50 }
  0x1a   :  { %12 = vsyncpa [#allocation3], 0  ;;  %v66_v5 = vld [vmem:[%s1123_s0 + $0x130] sm:$0xff]  ;;  %v67_v6 = vld [vmem:[%s1123_s0 + $0x138] sm:$0xff]  ;;  %149 = vperm.xlu0 %756, %v131_v3   ;;  %v95_v9 = vpack.c.bf16 %v35_v0, %v34_v63  ;;  %vm433_vm1 = vcmask 261120   ;;  %s785_s9 = smov [#allocation2]  }
  0x1b   :  { %v129_v8 = vld [vmem:[%s1125_s2 + $0x8] sm:$0xff]  ;;  %v401_v10 = vld [vmem:[%s1127_s4 + $0x10] sm:$0xff]  ;;  %v111_v11 = vpack.c.bf16 %v67_v6, %v66_v5  ;;  %v48_v12 = vld [vmem:[%s1123_s0 + $0xa0] sm:$0xff]  ;;  %s676_s10 = sshll.u32 %s785_s9, 4  ;;  %s677_s10 = int_to_ptr.vmem [resolvable:$true] %s676_s10 }
  0x1c   :  { %v49_v13 = vld [vmem:[%s1123_s0 + $0xa8] sm:$0xff]  ;;  %139 = vperm.xlu1 %757, %v129_v8   ;;  %v80_v14 = vld [vmem:[%s1123_s0 + $0x1a0] sm:$0xff]  ;;  %v402_v16 = vld [vmem:[%s1127_s4 + $0x18] sm:$0xff]  ;;  %v179_v17 = vsel %vm162_vm0, %v95_v9, 0  ;;  %p767_p1 = scmp.lt.s32.totalorder %s677_s10, %s677_s10 }
  0x1d   :  { %v81_v15 = vld [vmem:[%s1123_s0 + $0x1a8] sm:$0xff]  ;;  %v102_v18 = vpack.c.bf16 %v49_v13, %v48_v12  ;;  %v399_v19 = vld [vmem:[%s1127_s4] sm:$0xff]  ;;  %v227_v20 = vsel %vm162_vm0, %v111_v11, 0  ;;  %v46_v30 = vld [vmem:[%s1123_s0 + $0x90] sm:$0xff] }
  0x1e   :  { %415 = vperm.xlu0 %756, %v401_v10   ;;  %v118_v21 = vpack.c.bf16 %v81_v15, %v80_v14  ;;  %v32_v22 = vld [vmem:[%s1123_s0 + $0x20] sm:$0xff]  ;;  %v33_v23 = vld [vmem:[%s1123_s0 + $0x28] sm:$0xff]  ;;  %v47_v31 = vld [vmem:[%s1123_s0 + $0x98] sm:$0xff] }
  0x1f   :  { %705 = vmatpush3.bf16.xpose.msra.mxu0 %v182_v62  ;;  %v64_v24 = vld [vmem:[%s1123_s0 + $0x120] sm:$0xff]  ;;  %v65_v25 = vld [vmem:[%s1123_s0 + $0x128] sm:$0xff]  ;;  %v94_v27 = vpack.c.bf16 %v33_v23, %v32_v22  ;;  %v78_v32 = vld [vmem:[%s1123_s0 + $0x190] sm:$0xff]  ;;  %v101_v35 = vpack.c.bf16 %v47_v31, %v46_v30 }
  0x20   :  { %725 = vmatpush3.bf16.xpose.msra.mxu1 %v230_v1  ;;  %742 = vmatprep.subr.msk.bf16.mxu0 %vm162_vm0, %v103_v2  ;;  %v400_v26 = vld [vmem:[%s1127_s4 + $0x8] sm:$0xff]  ;;  %v571_v28 = vld [vmem:[%s1129_s6] sm:$0xff]  ;;  %v110_v29 = vpack.c.bf16 %v65_v25, %v64_v24  ;;  %v79_v33 = vld [vmem:[%s1123_s0 + $0x198] sm:$0xff] }
  0x21   :  { %750 = vmatprep.subr.msk.bf16.mxu1 %vm162_vm0, %v119_v4  ;;  %420 = vperm.xlu1 %757, %v402_v16   ;;  %v176_v34 = vsel %vm162_vm0, %v94_v27, 0  ;;  %v117_v37 = vpack.c.bf16 %v79_v33, %v78_v32  ;;  %v30_v38 = vld [vmem:[%s1123_s0 + $0x10] sm:$0xff]  ;;  %v31_v39 = vld [vmem:[%s1123_s0 + $0x18] sm:$0xff]  ;;  %v44_v44 = vld [vmem:[%s1123_s0 + $0x80] sm:$0xff] }
  0x22   :  { %405 = vperm.xlu0 %756, %v399_v19   ;;  %v224_v36 = vsel %vm162_vm0, %v110_v29, 0  ;;  %v62_v40 = vld [vmem:[%s1123_s0 + $0x110] sm:$0xff]  ;;  %v63_v41 = vld [vmem:[%s1123_s0 + $0x118] sm:$0xff]  ;;  %v93_v42 = vpack.c.bf16 %v31_v39, %v30_v38  ;;  %v45_v45 = vld [vmem:[%s1123_s0 + $0x88] sm:$0xff] }
  0x23   :  { %v109_v43 = vpack.c.bf16 %v63_v41, %v62_v40  ;;  %v76_v46 = vld [vmem:[%s1123_s0 + $0x180] sm:$0xff]  ;;  %v77_v47 = vld [vmem:[%s1123_s0 + $0x188] sm:$0xff]  ;;  %v100_v49 = vpack.c.bf16 %v45_v45, %v44_v44 }
  0x24   :  { %v173_v48 = vsel %vm162_vm0, %v93_v42, 0  ;;  %v116_v51 = vpack.c.bf16 %v77_v47, %v76_v46  ;;  %v28_v52 = vld [vmem:[%s1123_s0] sm:$0xff]  ;;  %v29_v53 = vld [vmem:[%s1123_s0 + $0x8] sm:$0xff] }
  0x25   :  { %410 = vperm.xlu1 %757, %v400_v26   ;;  %v221_v50 = vsel %vm162_vm0, %v109_v43, 0  ;;  %v60_v54 = vld [vmem:[%s1123_s0 + $0x100] sm:$0xff]  ;;  %v61_v56 = vld [vmem:[%s1123_s0 + $0x108] sm:$0xff]  ;;  %v92_v57 = vpack.c.bf16 %v29_v53, %v28_v52 }
  0x26   :  { %574 = vperm.xlu0 %756, %v571_v28   ;;  %v108_v58 = vpack.c.bf16 %v61_v56, %v60_v54  ;;  %v759_v61 = vld [vmem:[%s1124_s1 + $0x8] sm:$0xff]  }
  0x27   :  { %707 = vmatpush3.bf16.xpose.msra.mxu0 %v179_v17  ;;  %v170_v59 = vsel %vm162_vm0, %v92_v57, 0 }
  0x28   :  { %727 = vmatpush3.bf16.xpose.msra.mxu1 %v227_v20  ;;  %743 = vmatprep.subr.msk.bf16.mxu0 %vm162_vm0, %v102_v18  ;;  %v218_v60 = vsel %vm162_vm0, %v108_v58, 0 }
  0x29   :  { %751 = vmatprep.subr.msk.bf16.mxu1 %vm162_vm0, %v118_v21 }
  0x2f   :  { %709 = vmatpush3.bf16.xpose.msra.mxu0 %v176_v34 }
  0x30   :  { %729 = vmatpush3.bf16.xpose.msra.mxu1 %v224_v36  ;;  %744 = vmatprep.subr.msk.bf16.mxu0 %vm162_vm0, %v101_v35 }
  0x31   :  { %752 = vmatprep.subr.msk.bf16.mxu1 %vm162_vm0, %v117_v37 }
  0x37   :  { %711 = vmatpush3.bf16.xpose.msra.mxu0 %v173_v48 }
  0x38   :  { %731 = vmatpush3.bf16.xpose.msra.mxu1 %v221_v50  ;;  %745 = vmatprep.subr.msk.bf16.mxu0 %vm162_vm0, %v100_v49 }
  0x39   :  { %753 = vmatprep.subr.msk.bf16.mxu1 %vm162_vm0, %v116_v51 }
  0x3f   :  { %713 = vmatpush3.bf16.xpose.msra.mxu0 %v170_v59  ;;  %v760_v59 = vld [vmem:[%s1126_s3] sm:$0xff]  }
  0x40   :  { %733 = vmatpush3.bf16.xpose.msra.mxu1 %v218_v60  ;;  %v761_v60 = vld [vmem:[%s1126_s3 + $0x8] sm:$0xff]  }
  0x46   :  { %715 = vmatmul.mubr.msk.bf16.vlgmr.msra.gmra.mxu0 %vm162_vm0, %v940_v55 }
  0x47   :  { %735 = vmatmul.mubr.msk.bf16.vlgmr.msra.gmra.mxu1 %vm162_vm0, %v940_v55  ;;  %716 = vmatprep.mubr.msk.bf16.mxu0 %vm162_vm0, %v759_v61 }
  0x48   :  { %736 = vmatprep.mubr.msk.bf16.mxu1 %vm162_vm0, %v759_v61 }
  0x4e   :  { %717 = vmatmul.mubr.msk.bf16.gmra.mxu0 %vm162_vm0, %v759_v61 }
  0x4f   :  { %737 = vmatmul.mubr.msk.bf16.gmra.mxu1 %vm162_vm0, %v759_v61  ;;  %472 = vmatprep.mubr.bf16.mxu0 %v784_v7 }
  0x50   :  { %525 = vmatprep.mubr.bf16.mxu1 %v784_v7 }
  0x89   :  { %v145_v3 = vpop.permute.xlu0 %144  ;;  %v135_v55 = vpop.permute.xlu1 %134 }
  0x95   :  { %v150_v11 = vpop.permute.xlu0 %149 }
  0x97   :  { %v140_v13 = vpop.permute.xlu1 %139 }
 0x106   :  { %v299_v62 = vpop.f32.mrf.mxu0 }
 0x107   :  { %v352_v63 = vpop.f32.mrf.mxu1  ;;  %v300_v15 = vadd.f32 %v299_v62, %v135_v55 }
 0x108   :  { %v301_v0 = vpop.f32.mrf.mxu0  ;;  %v353_v42 = vadd.f32 %v352_v63, %v135_v55 }
 0x109   :  { %v354_v1 = vpop.f32.mrf.mxu1  ;;  %v302_v25 = vadd.f32 %v301_v0, %v135_v55  ;;  %v371_v53 = vmax.f32 %v300_v15, 0.0 }
 0x10a   :  { %v303_v2 = vpop.f32.mrf.mxu0  ;;  %v355_v26 = vadd.f32 %v354_v1, %v135_v55  ;;  %v373_v56 = vmax.f32 %v353_v42, 0.0 }
 0x10b   :  { %v356_v4 = vpop.f32.mrf.mxu1  ;;  %v304_v30 = vadd.f32 %v303_v2, %v140_v13  ;;  %v372_v43 = vmax.f32 %v302_v25, 0.0  ;;  %v416_v2 = vpop.permute.xlu0 %415 }
 0x10c   :  { %v305_v5 = vpop.f32.mrf.mxu0  ;;  %v357_v31 = vadd.f32 %v356_v4, %v140_v13  ;;  %v374_v46 = vmax.f32 %v355_v26, 0.0  ;;  %v421_v4 = vpop.permute.xlu1 %420 }
 0x10d   :  { %v358_v6 = vpop.f32.mrf.mxu1  ;;  %v306_v16 = vadd.f32 %v305_v5, %v140_v13  ;;  %v375_v47 = vmax.f32 %v304_v30, 0.0 }
 0x10e   :  { %v309_v8 = vpop.f32.mrf.mxu0  ;;  %v359_v20 = vadd.f32 %v358_v6, %v140_v13  ;;  %v377_v50 = vmax.f32 %v357_v31, 0.0 }
 0x10f   :  { %v362_v9 = vpop.f32.mrf.mxu1  ;;  %v310_v21 = vadd.f32 %v309_v8, %v145_v3  ;;  %v376_v34 = vmax.f32 %v306_v16, 0.0  ;;  %v387_v57 = vpack.c.bf16 %v375_v47, %v371_v53 }
 0x110   :  { %v311_v10 = vpop.f32.mrf.mxu0  ;;  %v363_v27 = vadd.f32 %v362_v9, %v145_v3  ;;  %v378_v38 = vmax.f32 %v359_v20, 0.0  ;;  %v389_v58 = vpack.c.bf16 %v377_v50, %v373_v56 }
 0x111   :  { %v364_v12 = vpop.f32.mrf.mxu1  ;;  %v312_v17 = vadd.f32 %v311_v10, %v145_v3  ;;  %v379_v39 = vmax.f32 %v310_v21, 0.0  ;;  %v388_v51 = vpack.c.bf16 %v376_v34, %v372_v43  ;;  %v406_v10 = vpop.permute.xlu0 %405 }
 0x112   :  { %v313_v14 = vpop.f32.mrf.mxu0  ;;  %v365_v22 = vadd.f32 %v364_v12, %v145_v3  ;;  %v381_v44 = vmax.f32 %v363_v27, 0.0  ;;  %v390_v54 = vpack.c.bf16 %v378_v38, %v374_v46  ;;  %v411_v12 = vpop.permute.xlu1 %410 }
 0x113   :  { %v314_v18 = vadd.f32 %v313_v14, %v150_v11  ;;  %v366_v19 = vpop.f32.mrf.mxu1  ;;  %v380_v35 = vmax.f32 %v312_v17, 0.0 }
 0x114   :  { %v367_v23 = vadd.f32 %v366_v19, %v150_v11  ;;  %v315_v24 = vpop.f32.mrf.mxu0  ;;  %v382_v40 = vmax.f32 %v365_v22, 0.0 }
 0x115   :  { %v316_v28 = vadd.f32 %v315_v24, %v150_v11  ;;  %v368_v29 = vpop.f32.mrf.mxu1  ;;  %v383_v32 = vmax.f32 %v314_v18, 0.0 }
 0x116   :  { %v369_v33 = vadd.f32 %v368_v29, %v150_v11  ;;  %v385_v36 = vmax.f32 %v367_v23, 0.0 }
 0x117   :  { %v384_v37 = vmax.f32 %v316_v28, 0.0  ;;  %v391_v48 = vpack.c.bf16 %v383_v32, %v379_v39 }
 0x118   :  { %v386_v41 = vmax.f32 %v369_v33, 0.0  ;;  %v393_v52 = vpack.c.bf16 %v385_v36, %v381_v44 }
 0x119   :  { %v392_v45 = vpack.c.bf16 %v384_v37, %v380_v35 }
 0x11a   :  { %v394_v49 = vpack.c.bf16 %v386_v41, %v382_v40 }
 0x11b   :  { %452 = vmatprep.subr.bf16.mxu0 %v392_v45 }
 0x11c   :  { %505 = vmatprep.subr.bf16.mxu1 %v394_v49  ;;  %453 = vmatpush1.bf16.msra.mxu0 %v391_v48 }
 0x11d   :  { %506 = vmatpush1.bf16.msra.mxu1 %v393_v52  ;;  %454 = vmatprep.subr.bf16.mxu0 %v388_v51 }
 0x11e   :  { %507 = vmatprep.subr.bf16.mxu1 %v390_v54 }
 0x120   :  { %455 = vmatpush1.bf16.msra.mxu0 %v387_v57  ;;  %v570_v57 = vld [vmem:[%s1128_s5] sm:$0xf]  ;;  %s762_s5 = scalar_lea.vmem %s677_s10, 512 }
 0x121   :  { %508 = vmatpush1.bf16.msra.mxu1 %v389_v58  ;;  %v575_v58 = vpop.permute.xlu0 %574  ;;  %p763_p0 = scmp.ne.s32.totalorder %s677_s10, %s762_s5  ;;  %p768_p2 = scmp.lt.s32.totalorder %s762_s5, %s762_s5 }
 0x123   :  { %692 = vmatmul.mubr.msk.bf16.vlgmr.msra.gmra.mxu0 %vm433_vm1, %v760_v59  ;;  %p769_p3 = por %p768_p2, %p767_p1 }
 0x124   :  { %694 = vmatmul.mubr.msk.bf16.vlgmr.msra.gmra.mxu1 %vm433_vm1, %v760_v59  ;;  %482 = vmatprep.mubr.bf16.mxu0 %v784_v7 }
 0x125   :  { %535 = vmatprep.mubr.bf16.mxu1 %v784_v7  ;;  %p770_p4 = pnand %p769_p3, %p763_p0 }
 0x12b   :  { %693 = vmatmul.mubr.msk.bf16.gmra.mxu0 %vm433_vm1, %v761_v60 }
 0x12c   :  { %695 = vmatmul.mubr.msk.bf16.gmra.mxu1 %vm433_vm1, %v761_v60  ;;  %612 = vmatprep.mubr.bf16.mxu0 %v784_v7 }
 0x12d   :  { %653 = vmatprep.mubr.bf16.mxu1 %v784_v7 }
 0x1e3   :  { %v474_v61 = vpop.f32.mrf.mxu0 }
 0x1e4   :  { %v527_v62 = vpop.f32.mrf.mxu1  ;;  %v475_v14 = vadd.f32 %v474_v61, %v406_v10 }
 0x1e5   :  { %v476_v63 = vpop.f32.mrf.mxu0  ;;  %v528_v40 = vadd.f32 %v527_v62, %v406_v10 }
 0x1e6   :  { %v529_v0 = vpop.f32.mrf.mxu1  ;;  %v477_v23 = vadd.f32 %v476_v63, %v406_v10  ;;  %v546_v51 = vmax.f32 %v475_v14, 0.0 }
 0x1e7   :  { %v478_v1 = vpop.f32.mrf.mxu0  ;;  %v530_v24 = vadd.f32 %v529_v0, %v406_v10  ;;  %v548_v53 = vmax.f32 %v528_v40, 0.0 }
 0x1e8   :  { %v531_v3 = vpop.f32.mrf.mxu1  ;;  %v479_v28 = vadd.f32 %v478_v1, %v411_v12  ;;  %v547_v41 = vmax.f32 %v477_v23, 0.0 }
 0x1e9   :  { %v480_v55 = vpop.f32.mrf.mxu0  ;;  %v532_v29 = vadd.f32 %v531_v3, %v411_v12  ;;  %v549_v44 = vmax.f32 %v530_v24, 0.0 }
 0x1ea   :  { %v533_v5 = vpop.f32.mrf.mxu1  ;;  %v481_v15 = vadd.f32 %v480_v55, %v411_v12  ;;  %v550_v45 = vmax.f32 %v479_v28, 0.0 }
 0x1eb   :  { %v484_v6 = vpop.f32.mrf.mxu0  ;;  %v534_v18 = vadd.f32 %v533_v5, %v411_v12  ;;  %v552_v48 = vmax.f32 %v532_v29, 0.0 }
 0x1ec   :  { %v537_v8 = vpop.f32.mrf.mxu1  ;;  %v485_v19 = vadd.f32 %v484_v6, %v416_v2  ;;  %v551_v32 = vmax.f32 %v481_v15, 0.0  ;;  %v562_v54 = vpack.c.bf16 %v550_v45, %v546_v51 }
 0x1ed   :  { %v486_v9 = vpop.f32.mrf.mxu0  ;;  %v538_v25 = vadd.f32 %v537_v8, %v416_v2  ;;  %v553_v36 = vmax.f32 %v534_v18, 0.0  ;;  %v564_v56 = vpack.c.bf16 %v552_v48, %v548_v53 }
 0x1ee   :  { %v539_v11 = vpop.f32.mrf.mxu1  ;;  %v487_v7 = vadd.f32 %v486_v9, %v416_v2  ;;  %v554_v37 = vmax.f32 %v485_v19, 0.0  ;;  %v563_v49 = vpack.c.bf16 %v551_v32, %v547_v41 }
 0x1ef   :  { %v488_v13 = vpop.f32.mrf.mxu0  ;;  %v540_v20 = vadd.f32 %v539_v11, %v416_v2  ;;  %v556_v42 = vmax.f32 %v538_v25, 0.0  ;;  %v565_v52 = vpack.c.bf16 %v553_v36, %v549_v44 }
 0x1f0   :  { %v489_v16 = vadd.f32 %v488_v13, %v421_v4  ;;  %v541_v17 = vpop.f32.mrf.mxu1  ;;  %v555_v33 = vmax.f32 %v487_v7, 0.0 }
 0x1f1   :  { %v542_v21 = vadd.f32 %v541_v17, %v421_v4  ;;  %v490_v22 = vpop.f32.mrf.mxu0  ;;  %v557_v38 = vmax.f32 %v540_v20, 0.0 }
 0x1f2   :  { %v491_v26 = vadd.f32 %v490_v22, %v421_v4  ;;  %v543_v27 = vpop.f32.mrf.mxu1  ;;  %v558_v30 = vmax.f32 %v489_v16, 0.0 }
 0x1f3   :  { %v544_v31 = vadd.f32 %v543_v27, %v421_v4  ;;  %v560_v34 = vmax.f32 %v542_v21, 0.0 }
 0x1f4   :  { %v559_v35 = vmax.f32 %v491_v26, 0.0  ;;  %v566_v46 = vpack.c.bf16 %v558_v30, %v554_v37 }
 0x1f5   :  { %v561_v39 = vmax.f32 %v544_v31, 0.0  ;;  %v568_v50 = vpack.c.bf16 %v560_v34, %v556_v42 }
 0x1f6   :  { %v567_v43 = vpack.c.bf16 %v559_v35, %v555_v33 }
 0x1f7   :  { %v569_v47 = vpack.c.bf16 %v561_v39, %v557_v38 }
 0x1f8   :  { %592 = vmatprep.subr.bf16.mxu0 %v567_v43 }
 0x1f9   :  { %633 = vmatprep.subr.bf16.mxu1 %v569_v47  ;;  %593 = vmatpush1.bf16.msra.mxu0 %v566_v46 }
 0x1fa   :  { %634 = vmatpush1.bf16.msra.mxu1 %v568_v50  ;;  %594 = vmatprep.subr.bf16.mxu0 %v563_v49 }
 0x1fb   :  { %635 = vmatprep.subr.bf16.mxu1 %v565_v52 }
 0x1fd   :  { %595 = vmatpush1.bf16.msra.mxu0 %v562_v54 }
 0x1fe   :  { %636 = vmatpush1.bf16.msra.mxu1 %v564_v56 }
 0x200   :  { %696 = vmatmul.mubr.msk.bf16.vlgmr.msra.gmra.mxu0 %vm433_vm1, %v570_v57 }
 0x201   :  { %697 = vmatmul.mubr.msk.bf16.vlgmr.msra.gmra.mxu1 %vm433_vm1, %v570_v57 }
 0x2c0   :  { %v614_v59 = vpop.f32.mrf.mxu0 }
 0x2c1   :  { %v615_v60 = vadd.f32 %v614_v59, %v575_v58  ;;  %v655_v61 = vpop.f32.mrf.mxu1 }
 0x2c2   :  { %v656_v62 = vadd.f32 %v655_v61, %v575_v58  ;;  %v616_v63 = vpop.f32.mrf.mxu0 }
 0x2c3   :  { %v662_v0 = vmax.f32 %v615_v60, 0.0  ;;  %v617_v1 = vadd.f32 %v616_v63, %v575_v58  ;;  %v657_v2 = vpop.f32.mrf.mxu1 }
 0x2c4   :  { %v664_v3 = vmax.f32 %v656_v62, 0.0  ;;  %v658_v4 = vadd.f32 %v657_v2, %v575_v58  ;;  %v618_v55 = vpop.f32.mrf.mxu0 }
 0x2c5   :  { %666 = vst [vmem:[#allocation2] sm:$0xff] %v662_v0  ;;  %v663_v5 = vmax.f32 %v617_v1, 0.0  ;;  %v659_v6 = vpop.f32.mrf.mxu1 }
 0x2c6   :  { %668 = vst [vmem:[#allocation2 + $0x10] sm:$0xff] %v664_v3  ;;  %v665_v8 = vmax.f32 %v658_v4, 0.0  ;;  %v619_v9 = vpop.f32.mrf.mxu0 }
 0x2c7   :  { %667 = vst [vmem:[#allocation2 + $0x8] sm:$0xff] %v663_v5  ;;  %v660_v10 = vpop.f32.mrf.mxu1 }
 0x2c8   :  { %669 = vst [vmem:[#allocation2 + $0x18] sm:$0xff] %v665_v8 }
 0x2c9   :  { %773 = shalt.err (!%p770_p4)
}
 0x2ca   :  { %679 = dma.vmem_to_hbm [thread:$0]  %s677_s10, 512, %s1130_s7, [#allocation3]  }
 0x2cb   :  { %782 = dma.done.wait [#allocation3], 512  }
 0x2cc   :  { %783 = vsyncadd [#allocation3], 4294966784 }
 0x2cd   :  { %683 = vsyncpa [#allocation3], 1 }

</bundles_post_ra>
